<compile_context>
chip_gen: v6e
topology: v6e:2x2x1
jax: 0.10.0
libtpu: 0.0.40
codegen_flags: <defaults>
</compile_context>

<pallas_src>
import jax
import jax.numpy as jnp
from jax.experimental import pallas as pl
from jax.experimental.pallas import tpu as pltpu  # noqa: F401  (TPU backend import)


def _identity_kernel(x_ref, o_ref):
    # x_ref and o_ref alias the same buffer (input_output_aliases={0: 0}), so the
    # identity requires no data movement at all.  Intentionally empty body.
    del x_ref, o_ref


def identity_forward(x: jax.Array) -> jax.Array:
    """Pallas implementation of Custom.forward: returns x unchanged."""
    # Mirror the PyTorch `print(x.shape)` side effect.
    # TODO(synk): under jax.jit this prints at trace time only, not on every call
    # (a per-call host callback would force a device->host sync and is deliberately avoided).
    print(x.shape)

    # Empty tensors: nothing to do (avoids a degenerate zero-sized pallas_call).
    if x.size == 0:
        return x

    return pl.pallas_call(
        _identity_kernel,
        out_shape=jax.ShapeDtypeStruct(x.shape, x.dtype),
        # Leave both operands in place (no auto-DMA, no blocking/tiling needed).
        in_specs=[pl.BlockSpec(memory_space=pl.ANY)],
        out_specs=pl.BlockSpec(memory_space=pl.ANY),
        # Output buffer IS the input buffer -> zero HBM read/write for the op itself.
        input_output_aliases={0: 0},
        # Tell XLA this call costs nothing (no flops, no bytes, no transcendentals).
        cost_estimate=pl.CostEstimate(flops=0, transcendentals=0, bytes_accessed=0),
    )(x)


# Truly zero-copy variant: with buffer donation the alias is honored end-to-end and no
# defensive copy is inserted.  Callers must not reuse `x` after calling this.
identity_forward_donated = jax.jit(identity_forward, donate_argnums=0)


if __name__ == "__main__":
    key = jax.random.PRNGKey(0)
    # Small NCHW input consistent with a conv-style module: (batch=2, C=4, H=16, W=16)
    x = jax.random.normal(key, (2, 4, 16, 16), dtype=jnp.float32)

    # Non-donated call so `x` stays valid for the correctness check below.
    y = identity_forward(x)
    y = jax.block_until_ready(y)

    assert y.shape == x.shape
    assert y.dtype == x.dtype
    assert bool(jnp.array_equal(y, x))

    print("KERNEL_OK")
</pallas_src>

<mosaic_0001>
module attributes {stable_mosaic.version = 11 : i64} {
  func.func @_identity_kernel(%arg0: memref<2x4x16x16xf32, #tpu.memory_space<any>>, %arg1: memref<2x4x16x16xf32, #tpu.memory_space<any>>) attributes {dimension_semantics = [], scalar_prefetch = 0 : i64, scratch_operands = 0 : i64, tpu.core_type = #tpu.core_type<tc>} {
    return
  }
}

</mosaic_0001>

<bundles_post_ra>
// kernel: tpu_custom_call.1
= control target key start
LH: loop header
LB: loop body
LE: loop exit
PB: predicated region body
PF: predicated region fallthrough
CT: control target
= control target key end

     0   :  { %s16_s0 = inlined_call_operand.hbm [shape: f32[2,4,16,16], index: 0, kind: input, shape index: {}, may-alias: {0,1}]   ;;  %s17_s1 = inlined_call_operand.hbm [shape: f32[2,4,16,16], index: 1, kind: output, shape index: {}, may-alias: {0,1}]  }

</bundles_post_ra>
